<compile_context>
chip_gen: v6e
topology: v6e:2x2x1
jax: 0.10.0
libtpu: 0.0.40
codegen_flags: <defaults>
</compile_context>

<pallas_src>
import jax
import jax.numpy as jnp
from jax import lax
from jax.experimental import pallas as pl
from jax.experimental.pallas import tpu as pltpu

# ---- deterministic "module parameters" (PlueckerParam defaults) ------------
ORIGIN = (0.0, 0.0, 0.0)
DIRECTION_MULTIPLIER = 1.0
MOMENT_MULTIPLIER = 1.0
CONTRACT_START = 3   # contract_start_channel
CONTRACT_END = 6     # contract_end_channel
NORMALIZE_EPS = 1e-12

LANES = 128
DEFAULT_BLOCK_ROWS = 1024   # 1024*128 rays/step, ~12 MiB dbl-buffered (f32)
MIN_GRID_STEPS = 4          # keep >= ~4 grid steps so v7x's 2 TCs both work
VMEM_LIMIT_BYTES = 48 << 20 # headroom for block_rows up to ~3k; <= physical on all gens


def _round_up(x, m):
    return ((x + m - 1) // m) * m


def _contract_points_kernel(x_ref, o_ref):
    """x_ref, o_ref: (6, R, 128) VMEM tiles, feature-major layout.

    Each channel slice x_ref[c] is a dense (R, 128) tile.  All math runs in
    float32 regardless of the I/O dtype (parity with the f32 torch module).
    """
    f32 = jnp.float32
    ox = x_ref[0].astype(f32)
    oy = x_ref[1].astype(f32)
    oz = x_ref[2].astype(f32)
    dx = x_ref[3].astype(f32)
    dy = x_ref[4].astype(f32)
    dz = x_ref[5].astype(f32)

    # origin subtraction (skipped at trace time when the component is 0)
    if ORIGIN[0] != 0.0:
        ox = ox - ORIGIN[0]
    if ORIGIN[1] != 0.0:
        oy = oy - ORIGIN[1]
    if ORIGIN[2] != 0.0:
        oz = oz - ORIGIN[2]

    # torch.nn.functional.normalize(d, p=2, dim=-1): d / max(||d||, eps).
    # Computed as d * rsqrt(||d||^2) on the EUP; explicit eps guard preserves
    # the max(norm, eps) semantics for the zero-direction case.  NOTE: padded
    # tail rows deliberately flow rsqrt(0)=inf through the *unselected* branch
    # of jnp.where -- where() is a select, so no NaN propagates.
    ss_d = dx * dx + dy * dy + dz * dz
    inv_dn = jnp.where(ss_d > NORMALIZE_EPS * NORMALIZE_EPS,
                       lax.rsqrt(ss_d),
                       1.0 / NORMALIZE_EPS)
    dx = dx * inv_dn
    dy = dy * inv_dn
    dz = dz * inv_dn

    # moment m = rays_o x rays_d
    mx = oy * dz - oz * dy
    my = oz * dx - ox * dz
    mz = ox * dy - oy * dx

    # multipliers (skipped at trace time when == 1.0)
    if DIRECTION_MULTIPLIER != 1.0:
        dx = dx * DIRECTION_MULTIPLIER
        dy = dy * DIRECTION_MULTIPLIER
        dz = dz * DIRECTION_MULTIPLIER
    if MOMENT_MULTIPLIER != 1.0:
        mx = mx * MOMENT_MULTIPLIER
        my = my * MOMENT_MULTIPLIER
        mz = mz * MOMENT_MULTIPLIER

    # MipNeRF-360 contraction on channels [CONTRACT_START, CONTRACT_END) = m.
    #   scale = 1                      if ||m|| <= 1
    #         = (2 - 1/||m||) / ||m||  otherwise (rsqrt finite on that branch)
    ss_q = mx * mx + my * my + mz * mz
    inv_qn = lax.rsqrt(ss_q)                       # EUP
    scale = jnp.where(ss_q <= 1.0, 1.0, (2.0 - inv_qn) * inv_qn)

    od = o_ref.dtype
    o_ref[0] = dx.astype(od)
    o_ref[1] = dy.astype(od)
    o_ref[2] = dz.astype(od)
    o_ref[3] = (mx * scale).astype(od)
    o_ref[4] = (my * scale).astype(od)
    o_ref[5] = (mz * scale).astype(od)


def contract_points_feature_major(x_cm, block_rows=DEFAULT_BLOCK_ROWS):
    """Preferred API: x_cm is (6, N) feature-major. Returns (6, N).

    Fast path (N % 128 == 0): no pads, no slices, no transposes -- the only
    HBM traffic is the kernel's own 2 * 6 * N * itemsize bytes.
    Ragged N: one minimal pad to the 128-lane boundary (plus the output
    slice); the grid still uses pl.cdiv so the row dimension is never padded.
    """
    c, n = x_cm.shape
    assert c == 6 and n > 0
    dtype = x_cm.dtype
    itemsize = jnp.dtype(dtype).itemsize
    sub = (8 * 4) // itemsize            # sublane packing: f32->8, bf16->16

    ragged = (n % LANES) != 0
    if ragged:
        n_pad = _round_up(n, LANES)      # minimal pad: <= 127 extra rays
        x_cm = jnp.pad(x_cm, ((0, 0), (0, n_pad - n)))
    else:
        n_pad = n
    nrow = n_pad // LANES                # rows of 128 rays

    # Row-block size: cap at block_rows, but aim for >= MIN_GRID_STEPS grid
    # steps (megacore sharding on v7x), rounded to the sublane multiple.
    r = min(block_rows, _round_up(pl.cdiv(nrow, MIN_GRID_STEPS), sub))
    if r >= nrow:
        r = nrow                         # single full-extent block (always legal)
    grid = (pl.cdiv(nrow, r),)           # partial last block handled by Pallas

    x3 = x_cm.reshape(6, nrow, LANES)    # free, contiguous reshape

    out3 = pl.pallas_call(
        _contract_points_kernel,
        out_shape=jax.ShapeDtypeStruct((6, nrow, LANES), dtype),
        grid=grid,
        in_specs=[pl.BlockSpec((6, r, LANES), lambda i: (0, i, 0))],
        out_specs=pl.BlockSpec((6, r, LANES), lambda i: (0, i, 0)),
        compiler_params=pltpu.CompilerParams(
            dimension_semantics=("parallel",),
            vmem_limit_bytes=VMEM_LIMIT_BYTES),
        cost_estimate=pl.CostEstimate(
            flops=35 * n_pad,
            transcendentals=2 * n_pad,
            bytes_accessed=2 * 6 * n_pad * itemsize),
    )(x3)

    out_cm = out3.reshape(6, n_pad)
    if ragged:
        out_cm = out_cm[:, :n]
    return out_cm


def contract_points_param(rays, block_rows=DEFAULT_BLOCK_ROWS):
    """Drop-in wrapper matching the PyTorch module: rays (N, 6) -> (N, 6).

    NOTE: the two transposes roughly triple the HBM traffic of this
    memory-bound op.  Real callers should keep the (6, N) feature-major layout
    end-to-end and call contract_points_feature_major directly.
    """
    n, c = rays.shape
    assert c == 6
    out_cm = contract_points_feature_major(rays.T, block_rows=block_rows)
    return out_cm.T


def _reference(rays):
    """Pure-JAX reference matching the PyTorch forward semantics (f32)."""
    origin = jnp.asarray(ORIGIN, dtype=rays.dtype)
    rays_o = rays[..., :3] - origin[None]
    rays_d = rays[..., 3:6]
    dn = jnp.maximum(jnp.linalg.norm(rays_d, axis=-1, keepdims=True),
                     NORMALIZE_EPS)
    rays_d = rays_d / dn
    m = jnp.cross(rays_o, rays_d)
    param_rays = jnp.concatenate(
        [rays_d * DIRECTION_MULTIPLIER, m * MOMENT_MULTIPLIER], axis=-1)
    x = param_rays[..., CONTRACT_START:CONTRACT_END]
    xn = jnp.linalg.norm(x, axis=-1, keepdims=True)
    safe = jnp.maximum(xn, NORMALIZE_EPS)
    contracted = jnp.where(xn <= 1.0, x, (2.0 - 1.0 / safe) * x / safe)
    return jnp.concatenate(
        [param_rays[..., :CONTRACT_START],
         contracted,
         param_rays[..., CONTRACT_END:]], axis=-1)


if __name__ == "__main__":
    key = jax.random.PRNGKey(0)

    # ---- ragged N (exercises the minimal lane pad + partial row-block) -----
    N = 1000
    rays = jax.random.normal(key, (N, 6), dtype=jnp.float32) * 2.0
    # hand-crafted corner cases: zero direction (eps path) and zero moment
    rays = rays.at[0].set(jnp.array([0.3, -0.2, 0.5, 0.0, 0.0, 0.0], jnp.float32))
    rays = rays.at[1].set(jnp.array([0.0, 0.0, 0.0, 1.0, 2.0, -3.0], jnp.float32))
    ref = _reference(rays)

    out_cm = contract_points_feature_major(rays.T)
    out_cm = jax.block_until_ready(out_cm)
    assert out_cm.shape == (6, N)
    assert jnp.allclose(out_cm.T, ref, atol=1e-5, rtol=1e-5)

    # ---- aligned N (fast path: zero wrapper-side copies) --------------------
    N2 = 1024
    rays2 = jax.random.normal(jax.random.PRNGKey(1), (N2, 6), jnp.float32) * 2.0
    ref2 = _reference(rays2)
    out2 = jax.block_until_ready(contract_points_feature_major(rays2.T))
    assert out2.shape == (6, N2)
    assert jnp.allclose(out2.T, ref2, atol=1e-5, rtol=1e-5)

    # ---- bf16 I/O (halves HBM traffic; math still f32 inside the kernel) ----
    rays_bf = rays2.astype(jnp.bfloat16)
    ref_bf = _reference(rays_bf.astype(jnp.float32))
    out_bf = jax.block_until_ready(contract_points_feature_major(rays_bf.T))
    assert out_bf.dtype == jnp.bfloat16 and out_bf.shape == (6, N2)
    assert jnp.allclose(out_bf.T.astype(jnp.float32), ref_bf, atol=2e-2, rtol=2e-2)

    # ---- compatibility wrapper matching the module's (N, 6) signature -------
    out = jax.block_until_ready(contract_points_param(rays))
    assert out.shape == (N, 6)
    assert jnp.allclose(out, ref, atol=1e-5, rtol=1e-5)

    print("KERNEL_OK")
</pallas_src>

<mosaic_0001>
module attributes {stable_mosaic.version = 11 : i64} {
  func.func @_contract_points_kernel(%arg0: i32, %arg1: memref<6x8x128xf32, #tpu.memory_space<vmem>>, %arg2: memref<6x8x128xf32, #tpu.memory_space<vmem>>) attributes {dimension_semantics = [#tpu.dimension_semantics<parallel>], iteration_bounds = array<i64: 1>, scalar_prefetch = 0 : i64, scratch_operands = 0 : i64, tpu.core_type = #tpu.core_type<tc>, window_params = [{transform_indices = @transform_0, window_bounds = array<i64: 6, 8, 128>}, {transform_indices = @transform_1, window_bounds = array<i64: 6, 8, 128>}]} {
    %c0 = arith.constant 0 : index
    %c0_0 = arith.constant 0 : index
    %c0_1 = arith.constant 0 : index
    %0 = vector.load %arg1[%c0, %c0_0, %c0_1] : memref<6x8x128xf32, #tpu.memory_space<vmem>>, vector<1x8x128xf32>
    %1 = vector.shape_cast %0 : vector<1x8x128xf32> to vector<8x128xf32>
    %c1 = arith.constant 1 : index
    %c0_2 = arith.constant 0 : index
    %c0_3 = arith.constant 0 : index
    %2 = vector.load %arg1[%c1, %c0_2, %c0_3] : memref<6x8x128xf32, #tpu.memory_space<vmem>>, vector<1x8x128xf32>
    %3 = vector.shape_cast %2 : vector<1x8x128xf32> to vector<8x128xf32>
    %c2 = arith.constant 2 : index
    %c0_4 = arith.constant 0 : index
    %c0_5 = arith.constant 0 : index
    %4 = vector.load %arg1[%c2, %c0_4, %c0_5] : memref<6x8x128xf32, #tpu.memory_space<vmem>>, vector<1x8x128xf32>
    %5 = vector.shape_cast %4 : vector<1x8x128xf32> to vector<8x128xf32>
    %c3 = arith.constant 3 : index
    %c0_6 = arith.constant 0 : index
    %c0_7 = arith.constant 0 : index
    %6 = vector.load %arg1[%c3, %c0_6, %c0_7] : memref<6x8x128xf32, #tpu.memory_space<vmem>>, vector<1x8x128xf32>
    %7 = vector.shape_cast %6 : vector<1x8x128xf32> to vector<8x128xf32>
    %c4 = arith.constant 4 : index
    %c0_8 = arith.constant 0 : index
    %c0_9 = arith.constant 0 : index
    %8 = vector.load %arg1[%c4, %c0_8, %c0_9] : memref<6x8x128xf32, #tpu.memory_space<vmem>>, vector<1x8x128xf32>
    %9 = vector.shape_cast %8 : vector<1x8x128xf32> to vector<8x128xf32>
    %c5 = arith.constant 5 : index
    %c0_10 = arith.constant 0 : index
    %c0_11 = arith.constant 0 : index
    %10 = vector.load %arg1[%c5, %c0_10, %c0_11] : memref<6x8x128xf32, #tpu.memory_space<vmem>>, vector<1x8x128xf32>
    %11 = vector.shape_cast %10 : vector<1x8x128xf32> to vector<8x128xf32>
    %12 = arith.mulf %7, %7 : vector<8x128xf32>
    %13 = arith.mulf %9, %9 : vector<8x128xf32>
    %14 = arith.addf %12, %13 : vector<8x128xf32>
    %15 = arith.mulf %11, %11 : vector<8x128xf32>
    %16 = arith.addf %14, %15 : vector<8x128xf32>
    %cst = arith.constant 1.000000e-24 : f32
    %17 = vector.broadcast %cst : f32 to vector<8x128xf32>
    %18 = arith.cmpf ogt, %16, %17 : vector<8x128xf32>
    %19 = math.rsqrt %16 : vector<8x128xf32>
    %cst_12 = arith.constant 9.99999995E+11 : f32
    %20 = vector.broadcast %cst_12 : f32 to vector<8x128xf32>
    %21 = arith.select %18, %19, %20 : vector<8x128xi1>, vector<8x128xf32>
    %22 = arith.mulf %7, %21 : vector<8x128xf32>
    %23 = arith.mulf %9, %21 : vector<8x128xf32>
    %24 = arith.mulf %11, %21 : vector<8x128xf32>
    %25 = arith.mulf %3, %24 : vector<8x128xf32>
    %26 = arith.mulf %5, %23 : vector<8x128xf32>
    %27 = arith.subf %25, %26 : vector<8x128xf32>
    %28 = arith.mulf %5, %22 : vector<8x128xf32>
    %29 = arith.mulf %1, %24 : vector<8x128xf32>
    %30 = arith.subf %28, %29 : vector<8x128xf32>
    %31 = arith.mulf %1, %23 : vector<8x128xf32>
    %32 = arith.mulf %3, %22 : vector<8x128xf32>
    %33 = arith.subf %31, %32 : vector<8x128xf32>
    %34 = arith.mulf %27, %27 : vector<8x128xf32>
    %35 = arith.mulf %30, %30 : vector<8x128xf32>
    %36 = arith.addf %34, %35 : vector<8x128xf32>
    %37 = arith.mulf %33, %33 : vector<8x128xf32>
    %38 = arith.addf %36, %37 : vector<8x128xf32>
    %39 = math.rsqrt %38 : vector<8x128xf32>
    %cst_13 = arith.constant 1.000000e+00 : f32
    %40 = vector.broadcast %cst_13 : f32 to vector<8x128xf32>
    %41 = arith.cmpf ole, %38, %40 : vector<8x128xf32>
    %cst_14 = arith.constant 2.000000e+00 : f32
    %42 = vector.broadcast %cst_14 : f32 to vector<8x128xf32>
    %43 = arith.subf %42, %39 : vector<8x128xf32>
    %44 = arith.mulf %43, %39 : vector<8x128xf32>
    %cst_15 = arith.constant 1.000000e+00 : f32
    %45 = vector.broadcast %cst_15 : f32 to vector<8x128xf32>
    %46 = arith.select %41, %45, %44 : vector<8x128xi1>, vector<8x128xf32>
    %c0_16 = arith.constant 0 : index
    %c0_17 = arith.constant 0 : index
    %c0_18 = arith.constant 0 : index
    %47 = vector.load %arg2[%c0_16, %c0_17, %c0_18] : memref<6x8x128xf32, #tpu.memory_space<vmem>>, vector<1x8x128xf32>
    %48 = vector.shape_cast %47 : vector<1x8x128xf32> to vector<8x128xf32>
    %49 = vector.shape_cast %22 : vector<8x128xf32> to vector<1x8x128xf32>
    tpu.vector_store %arg2[%c0_16, %c0_17, %c0_18], %49 {strides = array<i32>} : memref<6x8x128xf32, #tpu.memory_space<vmem>>, vector<1x8x128xf32>,
    %c1_19 = arith.constant 1 : index
    %c0_20 = arith.constant 0 : index
    %c0_21 = arith.constant 0 : index
    %50 = vector.load %arg2[%c1_19, %c0_20, %c0_21] : memref<6x8x128xf32, #tpu.memory_space<vmem>>, vector<1x8x128xf32>
    %51 = vector.shape_cast %50 : vector<1x8x128xf32> to vector<8x128xf32>
    %52 = vector.shape_cast %23 : vector<8x128xf32> to vector<1x8x128xf32>
    tpu.vector_store %arg2[%c1_19, %c0_20, %c0_21], %52 {strides = array<i32>} : memref<6x8x128xf32, #tpu.memory_space<vmem>>, vector<1x8x128xf32>,
    %c2_22 = arith.constant 2 : index
    %c0_23 = arith.constant 0 : index
    %c0_24 = arith.constant 0 : index
    %53 = vector.load %arg2[%c2_22, %c0_23, %c0_24] : memref<6x8x128xf32, #tpu.memory_space<vmem>>, vector<1x8x128xf32>
    %54 = vector.shape_cast %53 : vector<1x8x128xf32> to vector<8x128xf32>
    %55 = vector.shape_cast %24 : vector<8x128xf32> to vector<1x8x128xf32>
    tpu.vector_store %arg2[%c2_22, %c0_23, %c0_24], %55 {strides = array<i32>} : memref<6x8x128xf32, #tpu.memory_space<vmem>>, vector<1x8x128xf32>,
    %56 = arith.mulf %27, %46 : vector<8x128xf32>
    %c3_25 = arith.constant 3 : index
    %c0_26 = arith.constant 0 : index
    %c0_27 = arith.constant 0 : index
    %57 = vector.load %arg2[%c3_25, %c0_26, %c0_27] : memref<6x8x128xf32, #tpu.memory_space<vmem>>, vector<1x8x128xf32>
    %58 = vector.shape_cast %57 : vector<1x8x128xf32> to vector<8x128xf32>
    %59 = vector.shape_cast %56 : vector<8x128xf32> to vector<1x8x128xf32>
    tpu.vector_store %arg2[%c3_25, %c0_26, %c0_27], %59 {strides = array<i32>} : memref<6x8x128xf32, #tpu.memory_space<vmem>>, vector<1x8x128xf32>,
    %60 = arith.mulf %30, %46 : vector<8x128xf32>
    %c4_28 = arith.constant 4 : index
    %c0_29 = arith.constant 0 : index
    %c0_30 = arith.constant 0 : index
    %61 = vector.load %arg2[%c4_28, %c0_29, %c0_30] : memref<6x8x128xf32, #tpu.memory_space<vmem>>, vector<1x8x128xf32>
    %62 = vector.shape_cast %61 : vector<1x8x128xf32> to vector<8x128xf32>
    %63 = vector.shape_cast %60 : vector<8x128xf32> to vector<1x8x128xf32>
    tpu.vector_store %arg2[%c4_28, %c0_29, %c0_30], %63 {strides = array<i32>} : memref<6x8x128xf32, #tpu.memory_space<vmem>>, vector<1x8x128xf32>,
    %64 = arith.mulf %33, %46 : vector<8x128xf32>
    %c5_31 = arith.constant 5 : index
    %c0_32 = arith.constant 0 : index
    %c0_33 = arith.constant 0 : index
    %65 = vector.load %arg2[%c5_31, %c0_32, %c0_33] : memref<6x8x128xf32, #tpu.memory_space<vmem>>, vector<1x8x128xf32>
    %66 = vector.shape_cast %65 : vector<1x8x128xf32> to vector<8x128xf32>
    %67 = vector.shape_cast %64 : vector<8x128xf32> to vector<1x8x128xf32>
    tpu.vector_store %arg2[%c5_31, %c0_32, %c0_33], %67 {strides = array<i32>} : memref<6x8x128xf32, #tpu.memory_space<vmem>>, vector<1x8x128xf32>,
    return
  }
  func.func @transform_0(%arg0: i32) -> (i32, i32, i32) {
    %c0_i32 = arith.constant 0 : i32
    %c0_i32_0 = arith.constant 0 : i32
    %c0_i32_1 = arith.constant 0 : i32
    return %c0_i32, %arg0, %c0_i32_0 : i32, i32, i32
  }
  func.func @transform_1(%arg0: i32) -> (i32, i32, i32) {
    %c0_i32 = arith.constant 0 : i32
    %c0_i32_0 = arith.constant 0 : i32
    %c0_i32_1 = arith.constant 0 : i32
    return %c0_i32, %arg0, %c0_i32_0 : i32, i32, i32
  }
}

</mosaic_0001>

<bundles_post_ra>
// kernel: tpu_custom_call.1
= control target key start
LH: loop header
LB: loop body
LE: loop exit
PB: predicated region body
PF: predicated region fallthrough
CT: control target
= control target key end

     0   :  { %6 = vsyncpa [#allocation3], 0  ;;  %s173_s0 = inlined_call_operand.hbm [shape: f32[6,8,128], index: 0, kind: input, shape index: {}]   ;;  %s174_s1 = inlined_call_operand.hbm [shape: f32[6,8,128], index: 1, kind: output, shape index: {}]  }
   0x1   :  { %7 = vsyncpa [#allocation4], 0  ;;  %s147_s6 = smov [#allocation2]  }
   0x2   :  { %s13_s7 = sshll.u32 %s147_s6, 4  ;;  %s14_s7 = int_to_ptr.vmem [resolvable:$true] %s13_s7 }
   0x3   :  { %s111_s8 = scalar_lea.vmem %s14_s7, 768  ;;  %p116_p1 = scmp.lt.s32.totalorder %s14_s7, %s14_s7 }
   0x4   :  { %p112_p0 = scmp.ne.s32.totalorder %s14_s7, %s111_s8  ;;  %p117_p2 = scmp.lt.s32.totalorder %s111_s8, %s111_s8 }
   0x6   :  { %p118_p3 = por %p117_p2, %p116_p1 }
   0x8   :  { %p119_p4 = pnand %p118_p3, %p112_p0 }
   0xa   :  { %122 = shalt.err (!%p119_p4)
}
   0xb   :  { %s148_s9 = smov 128   ;;  %s149_s10 = smov 8  }
   0xc   :  { %19 = dma.hbm_to_vmem [thread:$0]  %s173_s0, 768, %s14_s7, [#allocation3], %s148_s9, %s148_s9, %s149_s10  }
   0xd   :  { %143 = dma.done.wait [#allocation3], 768  }
   0xe   :  { %144 = vsyncadd [#allocation3], 4294966528  ;;  %v29_v0 = vld [vmem:[#allocation2 + $0x18] sm:$0xff]  ;;  %v31_v1 = vld [vmem:[#allocation2 + $0x20] sm:$0xff]  ;;  %s150_s0 = smov [#allocation5]  }
   0xf   :  { %v33_v2 = vld [vmem:[#allocation2 + $0x28] sm:$0xff]  ;;  %v34_v3 = vmul.f32 %v29_v0, %v29_v0  ;;  %v35_v4 = vmul.f32 %v31_v1, %v31_v1  ;;  %v23_v10 = vld [vmem:[#allocation2] sm:$0xff]  ;;  %v27_v12 = vld [vmem:[#allocation2 + $0x10] sm:$0xff]  ;;  %s83_s13 = sshll.u32 %s150_s0, 4  ;;  %s84_s13 = int_to_ptr.vmem [resolvable:$true] %s83_s13 }
  0x10   :  { %v37_v5 = vmul.f32 %v33_v2, %v33_v2  ;;  %v25_v11 = vld [vmem:[#allocation2 + $0x8] sm:$0xff]  ;;  %s123_s14 = scalar_lea.vmem %s84_s13, 768  ;;  %p128_p6 = scmp.lt.s32.totalorder %s84_s13, %s84_s13 }
  0x11   :  { %v36_v6 = vadd.f32 %v35_v4, %v34_v3  ;;  %p124_p5 = scmp.ne.s32.totalorder %s84_s13, %s123_s14  ;;  %p129_p7 = scmp.lt.s32.totalorder %s123_s14, %s123_s14 }
  0x13   :  { %v38_v7 = vadd.f32 %v37_v5, %v36_v6  ;;  %p130_p8 = por %p129_p7, %p128_p6 }
  0x15   :  { %99 = vrsqrt.f32 %v38_v7  ;;  %vm39_vm0 = vcmp.gt.f32.partialorder %v38_v7, 1e-24  ;;  %p131_p9 = pnand %p130_p8, %p124_p5 }
  0x22   :  { %v100_v8 = vpop.eup %99 }
  0x23   :  { %v41_v9 = vsel %vm39_vm0, %v100_v8, 1e+12 }
  0x24   :  { %v42_v13 = vmul.f32 %v41_v9, %v29_v0  ;;  %v43_v14 = vmul.f32 %v41_v9, %v31_v1  ;;  %v44_v15 = vmul.f32 %v41_v9, %v33_v2 }
  0x26   :  { %64 = vst [vmem:[#allocation5] sm:$0xff] %v42_v13  ;;  %v51_v16 = vmul.f32 %v43_v14, %v23_v10  ;;  %66 = vst [vmem:[#allocation5 + $0x8] sm:$0xff] %v43_v14  ;;  %v49_v17 = vmul.f32 %v44_v15, %v23_v10  ;;  %v45_v18 = vmul.f32 %v44_v15, %v25_v11 }
  0x27   :  { %68 = vst [vmem:[#allocation5 + $0x10] sm:$0xff] %v44_v15  ;;  %v46_v19 = vmul.f32 %v43_v14, %v27_v12  ;;  %v48_v20 = vmul.f32 %v42_v13, %v27_v12  ;;  %v52_v21 = vmul.f32 %v42_v13, %v25_v11 }
  0x29   :  { %v47_v22 = vsub.f32 %v45_v18, %v46_v19  ;;  %v50_v23 = vsub.f32 %v48_v20, %v49_v17  ;;  %v53_v24 = vsub.f32 %v51_v16, %v52_v21 }
  0x2b   :  { %v54_v25 = vmul.f32 %v47_v22, %v47_v22  ;;  %v55_v26 = vmul.f32 %v50_v23, %v50_v23  ;;  %v57_v27 = vmul.f32 %v53_v24, %v53_v24 }
  0x2d   :  { %v56_v28 = vadd.f32 %v55_v26, %v54_v25 }
  0x2f   :  { %v58_v29 = vadd.f32 %v57_v27, %v56_v28 }
  0x31   :  { %101 = vrsqrt.f32 %v58_v29  ;;  %vm60_vm1 = vcmp.le.f32.partialorder %v58_v29, 1.0 }
  0x3e   :  { %v102_v30 = vpop.eup %101 }
  0x3f   :  { %v61_v31 = vsub.f32 2.0, %v102_v30 }
  0x41   :  { %v62_v32 = vmul.f32 %v102_v30, %v61_v31 }
  0x43   :  { %v63_v33 = vsel %vm60_vm1, 1.0, %v62_v32 }
  0x44   :  { %v69_v34 = vmul.f32 %v63_v33, %v47_v22  ;;  %v72_v35 = vmul.f32 %v63_v33, %v50_v23  ;;  %v75_v36 = vmul.f32 %v63_v33, %v53_v24 }
  0x46   :  { %71 = vst [vmem:[#allocation5 + $0x18] sm:$0xff] %v69_v34  ;;  %74 = vst [vmem:[#allocation5 + $0x20] sm:$0xff] %v72_v35 }
  0x47   :  { %77 = vst [vmem:[#allocation5 + $0x28] sm:$0xff] %v75_v36 }
  0x48   :  { %134 = shalt.err (!%p131_p9)
}
  0x49   :  { %89 = dma.vmem_to_hbm [thread:$0]  %s84_s13, 768, %s174_s1, [#allocation4], %s148_s9, %s148_s9, %s149_s10  }
  0x4a   :  { %145 = dma.done.wait [#allocation4], 768  }
  0x4b   :  { %146 = vsyncadd [#allocation4], 4294966528 }
  0x4c   :  { %93 = vsyncpa [#allocation3], 1 }
  0x4d   :  { %94 = vsyncpa [#allocation4], 1 }

</bundles_post_ra>
